<compile_context>
chip_gen: v6e
topology: v6e:2x2x1
jax: 0.10.0
libtpu: 0.0.40
codegen_flags: <defaults>
</compile_context>

<pallas_src>
import jax
import jax.numpy as jnp
import numpy as np
from jax.experimental import pallas as pl
from jax.experimental.pallas import tpu as pltpu


def _anomaly_l1_num_kernel(pred_ref, w_ref, vq_ref, num_ref, acc_ref):
    # Grid = (N, L).  Kernel views (N squeezed):
    #   pred_ref : (V, C, TL)   native dtype
    #   w_ref    : (1, TL)      f32 weights = 1 - clamp(mask_extreme + mask_valid, 1)
    #   vq_ref   : (C, 1)       f32 per-channel quantization code
    #   num_ref  : (1, 8, 128)  f32 per-n numerator (broadcast scalar, written last step)
    #   acc_ref  : (C, TL)      f32 scratch: per-lane partial sums
    l = pl.program_id(1)

    @pl.when(l == 0)
    def _():
        acc_ref[...] = jnp.zeros_like(acc_ref)

    pred = pred_ref[...].astype(jnp.float32)       # cast after DMA (native-dtype stream)
    w = w_ref[...]                                 # (1, TL)
    vq = vq_ref[...]                               # (C, 1)

    # |pred - vq| * weights ; masked (weights==0) positions contribute 0, matching the
    # in-place target:=pred replacement of the reference.
    diff = jnp.abs(pred - vq[None, :, :]) * w[None, :, :]   # (V, C, TL)

    # Reduce only over the leading V axis (pure VALU adds) — keep per-lane partials.
    acc_ref[...] += jnp.sum(diff, axis=0)                    # (C, TL)

    @pl.when(l == pl.num_programs(1) - 1)
    def _():
        # Single XLU collapse per n, deferred to the last spatial tile.
        total = jnp.sum(acc_ref[...])
        num_ref[...] = jnp.broadcast_to(total, num_ref.shape)


def _pick_lane_tile(thw, v, c, itemsize, target_bytes=4 * 1024 * 1024):
    """Largest multiple-of-128 divisor of THW whose pred block stays <= target_bytes."""
    if thw % 128 != 0:
        return thw  # fall back to a single full-extent block (still valid BlockSpec)
    per_lane = v * c * itemsize
    candidates = [d for d in range(128, thw + 1, 128) if thw % d == 0]
    fitting = [d for d in candidates if d * per_lane <= target_bytes]
    return fitting[-1] if fitting else candidates[0]


def anomaly_l1_loss(pred, mask_extreme, mask_valid, vq_0):
    N, V, C, T, H, W = pred.shape
    THW = T * H * W

    # --- tiny plain-JAX glue (masks are V*C times smaller than pred) -----------------
    mask = mask_extreme.astype(jnp.float32)[:, None, :, :] + mask_valid.astype(jnp.float32)
    mask = jnp.minimum(mask, 1.0)                            # (N, T, H, W)
    weights = (1.0 - mask).reshape(N, 1, THW)                # lane-dense
    den = jnp.float32(V * C) * jnp.sum(weights)              # sum(weights) over full bcast

    pred_r = pred.reshape(N, V, C, THW)                      # free reshape, native dtype
    vq = vq_0.astype(jnp.float32)[:, :, None]                # (N, C, 1)

    TL = _pick_lane_tile(THW, V, C, pred.dtype.itemsize)
    num_l = THW // TL if THW % TL == 0 else 1
    if THW % TL != 0:
        TL = THW

    num = pl.pallas_call(
        _anomaly_l1_num_kernel,
        out_shape=jax.ShapeDtypeStruct((N, 8, 128), jnp.float32),
        grid_spec=pltpu.PrefetchScalarGridSpec(
            num_scalar_prefetch=0,
            grid=(N, num_l),
            in_specs=[
                pl.BlockSpec((None, V, C, TL), lambda n, l: (n, 0, 0, l)),  # pred
                pl.BlockSpec((None, 1, TL), lambda n, l: (n, 0, l)),        # weights
                pl.BlockSpec((None, C, 1), lambda n, l: (n, 0, 0)),         # vq_0
            ],
            out_specs=pl.BlockSpec((1, 8, 128), lambda n, l: (n, 0, 0)),
            scratch_shapes=[pltpu.VMEM((C, TL), jnp.float32)],
        ),
        compiler_params=pltpu.CompilerParams(
            dimension_semantics=("parallel", "arbitrary"),
            vmem_limit_bytes=32 * 1024 * 1024,
        ),
    )(pred_r, weights, vq)

    return jnp.sum(num[:, 0, 0]) / den


def _reference_loss(pred, me, mv, vq0):
    # Pure-JAX reference mirroring the PyTorch forward exactly.
    pred = pred.astype(jnp.float32)
    mask = me[:, None, None, None, :, :] + mv[:, None, None, :, :, :]
    mask = jnp.where(mask > 1.0, 1.0, mask)
    mask = jnp.broadcast_to(mask, pred.shape)
    weights = 1.0 - mask
    target = jnp.broadcast_to(vq0[:, None, :, None, None, None], pred.shape)
    target = jnp.where(mask == 1.0, pred, target)
    loss = jnp.abs(pred - target) * weights
    return jnp.sum(loss) / jnp.sum(weights)


if __name__ == "__main__":
    # Small shapes consistent with the module: n_dynamic(V)=3, dim(C)=8, delta_t(T)=4.
    N, V, C, T, H, W = 2, 3, 8, 4, 16, 16

    key = jax.random.PRNGKey(0)
    k_pred, k_me, k_mv, k_vq = jax.random.split(key, 4)

    pred = jax.random.normal(k_pred, (N, V, C, T, H, W), dtype=jnp.float32)
    mask_extreme = (jax.random.uniform(k_me, (N, H, W)) > 0.7).astype(jnp.float32)
    mask_valid = (jax.random.uniform(k_mv, (N, T, H, W)) > 0.5).astype(jnp.float32)
    vq_0 = jax.random.normal(k_vq, (N, C), dtype=jnp.float32)

    loss = jax.block_until_ready(anomaly_l1_loss(pred, mask_extreme, mask_valid, vq_0))
    ref = jax.block_until_ready(_reference_loss(pred, mask_extreme, mask_valid, vq_0))

    assert np.isfinite(float(loss)), "kernel produced non-finite loss"
    np.testing.assert_allclose(np.asarray(loss), np.asarray(ref), rtol=1e-5, atol=1e-5)
    print("KERNEL_OK")
</pallas_src>

<mosaic_0001>
module attributes {stable_mosaic.version = 11 : i64} {
  func.func @_anomaly_l1_num_kernel(%arg0: i32, %arg1: i32, %arg2: memref<1x3x8x1024xf32, #tpu.memory_space<vmem>>, %arg3: memref<1x1x1024xf32, #tpu.memory_space<vmem>>, %arg4: memref<1x8x1xf32, #tpu.memory_space<vmem>>, %arg5: memref<1x8x128xf32, #tpu.memory_space<vmem>>, %arg6: memref<8x1024xf32, #tpu.memory_space<vmem>>) attributes {dimension_semantics = [#tpu.dimension_semantics<parallel>, #tpu.dimension_semantics<arbitrary>], iteration_bounds = array<i64: 2, 1>, scalar_prefetch = 0 : i64, scratch_operands = 1 : i64, tpu.core_type = #tpu.core_type<tc>, window_params = [{transform_indices = @transform_0, window_bounds = array<i64: 1, 3, 8, 1024>}, {transform_indices = @transform_1, window_bounds = array<i64: 1, 1, 1024>}, {transform_indices = @transform_2, window_bounds = array<i64: 1, 8, 1>}, {transform_indices = @transform_3, window_bounds = array<i64: 1, 8, 128>}]} {
    %c0_i32 = arith.constant 0 : i32
    %0 = arith.cmpi eq, %arg1, %c0_i32 : i32
    %1 = arith.extui %0 : i1 to i32
    %c0_i32_0 = arith.constant 0 : i32
    %2 = arith.cmpi ne, %1, %c0_i32_0 : i32
    scf.if %2 {
      %cst_16 = arith.constant 0.000000e+00 : f32
      %23 = vector.broadcast %cst_16 : f32 to vector<8x1024xf32>
      %c0_17 = arith.constant 0 : index
      %c0_18 = arith.constant 0 : index
      %24 = vector.load %arg6[%c0_17, %c0_18] : memref<8x1024xf32, #tpu.memory_space<vmem>>, vector<8x1024xf32>
      tpu.vector_store %arg6[%c0_17, %c0_18], %23 {strides = array<i32>} : memref<8x1024xf32, #tpu.memory_space<vmem>>, vector<8x1024xf32>,
    } else {
    }
    %c0 = arith.constant 0 : index
    %c0_1 = arith.constant 0 : index
    %c0_2 = arith.constant 0 : index
    %c0_3 = arith.constant 0 : index
    %3 = vector.load %arg2[%c0, %c0_1, %c0_2, %c0_3] : memref<1x3x8x1024xf32, #tpu.memory_space<vmem>>, vector<1x3x8x1024xf32>
    %4 = vector.shape_cast %3 : vector<1x3x8x1024xf32> to vector<3x8x1024xf32>
    %c0_4 = arith.constant 0 : index
    %c0_5 = arith.constant 0 : index
    %c0_6 = arith.constant 0 : index
    %5 = vector.load %arg3[%c0_4, %c0_5, %c0_6] : memref<1x1x1024xf32, #tpu.memory_space<vmem>>, vector<1x1x1024xf32>
    %6 = vector.shape_cast %5 : vector<1x1x1024xf32> to vector<1x1024xf32>
    %c0_7 = arith.constant 0 : index
    %c0_8 = arith.constant 0 : index
    %c0_9 = arith.constant 0 : index
    %7 = vector.load %arg4[%c0_7, %c0_8, %c0_9] : memref<1x8x1xf32, #tpu.memory_space<vmem>>, vector<1x8x1xf32>
    %8 = vector.shape_cast %7 : vector<1x8x1xf32> to vector<8x1xf32>
    %9 = vector.shape_cast %8 : vector<8x1xf32> to vector<1x8x1xf32>
    %10 = vector.broadcast %9 : vector<1x8x1xf32> to vector<3x8x1024xf32>
    %11 = arith.subf %4, %10 : vector<3x8x1024xf32>
    %12 = math.absf %11 : vector<3x8x1024xf32>
    %13 = vector.shape_cast %6 : vector<1x1024xf32> to vector<1x1x1024xf32>
    %14 = vector.broadcast %13 : vector<1x1x1024xf32> to vector<3x8x1024xf32>
    %15 = arith.mulf %12, %14 : vector<3x8x1024xf32>
    %c0_10 = arith.constant 0 : index
    %c0_11 = arith.constant 0 : index
    %16 = vector.load %arg6[%c0_10, %c0_11] : memref<8x1024xf32, #tpu.memory_space<vmem>>, vector<8x1024xf32>
    %cst = arith.constant dense<0.000000e+00> : vector<8x1024xf32>
    %17 = vector.multi_reduction <add>, %15, %cst [0] : vector<3x8x1024xf32> to vector<8x1024xf32>
    %18 = arith.addf %16, %17 : vector<8x1024xf32>
    %c0_12 = arith.constant 0 : index
    %c0_13 = arith.constant 0 : index
    %19 = vector.load %arg6[%c0_12, %c0_13] : memref<8x1024xf32, #tpu.memory_space<vmem>>, vector<8x1024xf32>
    tpu.vector_store %arg6[%c0_12, %c0_13], %18 {strides = array<i32>} : memref<8x1024xf32, #tpu.memory_space<vmem>>, vector<8x1024xf32>,
    %c0_i32_14 = arith.constant 0 : i32
    %20 = arith.cmpi eq, %arg1, %c0_i32_14 : i32
    %21 = arith.extui %20 : i1 to i32
    %c0_i32_15 = arith.constant 0 : i32
    %22 = arith.cmpi ne, %21, %c0_i32_15 : i32
    scf.if %22 {
      %c0_16 = arith.constant 0 : index
      %c0_17 = arith.constant 0 : index
      %23 = vector.load %arg6[%c0_16, %c0_17] : memref<8x1024xf32, #tpu.memory_space<vmem>>, vector<8x1024xf32>
      %24 = vector.shape_cast %23 : vector<8x1024xf32> to vector<1x8x1024xf32>
      %cst_18 = arith.constant dense<0.000000e+00> : vector<1xf32>
      %25 = vector.multi_reduction <add>, %24, %cst_18 [1, 2] : vector<1x8x1024xf32> to vector<1xf32>
      %26 = vector.shape_cast %25 : vector<1xf32> to vector<1x1x1xf32>
      %27 = vector.extract %26[0, 0, 0] : f32 from vector<1x1x1xf32>
      %28 = vector.broadcast %27 : f32 to vector<1x8x128xf32>
      %c0_19 = arith.constant 0 : index
      %c0_20 = arith.constant 0 : index
      %c0_21 = arith.constant 0 : index
      %29 = vector.load %arg5[%c0_19, %c0_20, %c0_21] : memref<1x8x128xf32, #tpu.memory_space<vmem>>, vector<1x8x128xf32>
      tpu.vector_store %arg5[%c0_19, %c0_20, %c0_21], %28 {strides = array<i32>} : memref<1x8x128xf32, #tpu.memory_space<vmem>>, vector<1x8x128xf32>,
    } else {
    }
    return
  }
  func.func @transform_0(%arg0: i32, %arg1: i32) -> (i32, i32, i32, i32) {
    %c0_i32 = arith.constant 0 : i32
    %c0_i32_0 = arith.constant 0 : i32
    %c0_i32_1 = arith.constant 0 : i32
    return %arg0, %c0_i32, %c0_i32_0, %arg1 : i32, i32, i32, i32
  }
  func.func @transform_1(%arg0: i32, %arg1: i32) -> (i32, i32, i32) {
    %c0_i32 = arith.constant 0 : i32
    %c0_i32_0 = arith.constant 0 : i32
    return %arg0, %c0_i32, %arg1 : i32, i32, i32
  }
  func.func @transform_2(%arg0: i32, %arg1: i32) -> (i32, i32, i32) {
    %c0_i32 = arith.constant 0 : i32
    %c0_i32_0 = arith.constant 0 : i32
    %c0_i32_1 = arith.constant 0 : i32
    return %arg0, %c0_i32, %c0_i32_0 : i32, i32, i32
  }
  func.func @transform_3(%arg0: i32, %arg1: i32) -> (i32, i32, i32) {
    %c0_i32 = arith.constant 0 : i32
    %c0_i32_0 = arith.constant 0 : i32
    %c0_i32_1 = arith.constant 0 : i32
    return %arg0, %c0_i32, %c0_i32_0 : i32, i32, i32
  }
}

</mosaic_0001>

<bundles_post_ra>
// kernel: tpu_custom_call.1
= control target key start
LH: loop header
LB: loop body
LE: loop exit
PB: predicated region body
PF: predicated region fallthrough
CT: control target
= control target key end

     0   :  { %8 = vsyncpa [#allocation4], 0  ;;  %s1064_s0 = inlined_call_operand.hbm [shape: f32[2,3,8,1024], index: 0, kind: input, shape index: {}]   ;;  %s1065_s1 = inlined_call_operand.vmem [shape: f32[2,1,1024], index: 1, kind: input, shape index: {}]   ;;  %s1066_s2 = inlined_call_operand.vmem [shape: f32[2,8,1], index: 2, kind: input, shape index: {}]   ;;  %s1067_s3 = inlined_call_operand.hbm [shape: f32[2,8,128], index: 3, kind: output, shape index: {}]  }
   0x1   :  { %10 = vsyncpa [#allocation4 + $0x1], 0 }
   0x2   :  { %11 = vsyncpa [#allocation5], 0 }
   0x3   :  { %13 = vsyncpa [#allocation5 + $0x1], 0  ;;  %s822_s12 = smov 0   ;;  %s824_s13 = smov 0  }
   0x4   :  { %s826_s14 = smov 0   ;;  %s828_s15 = smov 0  }
   0x5   :  { %s830_s16 = smov 0   ;;  %s832_s17 = smov 0  }
   0x6 LB: > { %s603_s18 = sadd.s32 4294967295, %s795_s17   ;;  %s604_s19 = sadd.s32 4294967294, %s795_s17   ;;  %s795_s17 = sphi %s832_s17, %s19_s17   ;;  %s791_s16 = sphi %s830_s16, %s1078_s16   ;;  %s787_s15 = sphi %s828_s15, %s1077_s15   ;;  %s783_s14 = sphi %s826_s14, %s1076_s14   ;;  %s779_s13 = sphi %s824_s13, %s1075_s13   ;;  %s775_s12 = sphi %s822_s12, %s1074_s12  }
   0x7   : > { %s31_s20 = sadd.s32 1, %s791_s16  ;;  %s40_s21 = sadd.s32 1, %s783_s14 }
   0x8   : > { %p33_p0 = scmp.ge.s32.totalorder %s31_s20, 2  ;;  %p47_p1 = scmp.ne.s32.totalorder %s783_s14, %s779_s13 }
   0x9   : > { %p48_p2 = scmp.eq.s32.totalorder %s795_s17, 0  ;;  %p53_p3 = scmp.ne.s32.totalorder %s779_s13, %s775_s12 }
   0xa   : > { %s1080_s20 = smov (%p33_p0, %s31_s20), 0  ;;  %p54_p5 = scmp.eq.s32.totalorder %s603_s18, 0 }
   0xb   : > { %p863_p4 = por %p48_p2, %p47_p1  ;;  %s35_s23 = ssub.s32 %s791_s16, %s1080_s20 }
   0xc   : > { %p131_p6 = scmp.eq.s32.totalorder %s603_s18, 1  ;;  %p38_p7 = scmp.eq.s32.totalorder %s35_s23, 0 }
   0xd   : > { %p869_p8 = por %p54_p5, %p53_p3  ;;  %p137_p10 = scmp.eq.s32.totalorder %s604_s19, 1 }
   0xe   : > { %p873_p9 = por %p131_p6, %p47_p1  ;;  %p633_p13 = scmp.lt.s32.totalorder %s795_s17, 2 }
   0xf   : > { %s878_s26 = scalar_select %p38_p7, %s783_s14, %s40_s21  }
  0x10   : > { %p880_p11 = por %p137_p10, %p53_p3  ;;  %s157_s28 = sand.u32 1, %s783_s14  }
  0x11   : > { %s616_s29 = smul.u32 192, %s157_s28  ;;  %p890_p0 = pnand %p633_p13, %p863_p4 }
  0x12   : > { %s617_s30 = smul.u32 3072, %s791_s16  ;;  %p608_p1 = scmp.ge.s32.totalorder %s795_s17, 1 }
  0x13   : > { %s161_s8 = scalar_lea.vmem [#allocation3], %s616_s29  ;;  %s158_s10 = scalar_lea.sflag [#allocation4], %s157_s28 }
  0x14   : > { %s169_s7 = scalar_lea.hbm %s1064_s0, %s617_s30  ;;  %s170_s9 = sshll.u32 %s161_s8, 4  ;;  %s171_s9 = int_to_ptr.vmem [resolvable:$true] %s170_s9 }
  0x15   : > { %p689_p2 = pneg %p890_p0  ;;  %s700_s11 = scalar_lea.vmem %s171_s9, 3072 }
  0x16   : > { %p701_p3 = scmp.ne.s32.totalorder %s171_s9, %s700_s11  ;;  %s797_s18 = smov [#allocation3]  }
  0x17   : > { %s705_s19 = sshll.u32 %s797_s18, 4  ;;  %s706_s19 = int_to_ptr.vmem [resolvable:$false] %s705_s19 }
  0x18   : > { %p703_p5 = pnand %p701_p3, %p689_p2  ;;  %s707_s21 = scalar_lea.vmem %s706_s19, 6144 }
  0x19   : > { %p708_p4 = scmp.lt.s32.totalorder %s171_s9, %s706_s19  ;;  %p709_p7 = scmp.lt.s32.totalorder %s707_s21, %s700_s11 }
  0x1a   : > { %p704_p6 = pneg %p703_p5 }
  0x1b   : > { %p710_p10 = por %p709_p7, %p708_p4 }
  0x1d   : > { %p711_p13 = pnand %p710_p10, %p704_p6 }
  0x1f   : > { %714 = shalt.err (!%p711_p13)
}
  0x20   : > { %s798_s22 = smov 1024   ;;  %s799_s23 = smov 64  }
  0x21   : > { %628 = dma.hbm_to_vmem [thread:$0]  (!%p890_p0), %s169_s7, 3072, %s171_s9, %s158_s10, %s798_s22, %s798_s22, %s799_s23  }
  0x22   : > { %p197_p12 = scmp.lt.s32.totalorder %s795_s17, 3 }
  0x24   : > { %p198_p2 = pnand %p608_p1, %p197_p12 }
  0x25   : > { %s906_s28 = sand.u32 (!%p198_p2), 1, %s779_s13  }
  0x26   : > { %201 = sbr.rel (%p198_p2) target bundleno = 421 (0x1a5), region = 32  ;;  %s204_s30 = scalar_lea.sflag (!%p198_p2), [#allocation4], %s906_s28 }
  0x27   : > { %s618_s29 = smul.u32 (!%p198_p2), 192, %s906_s28 }
  0x29   : > { %s910_s5 = scalar_lea.vmem (!%p198_p2), [#allocation3], %s618_s29 }
  0x2b   : > { %766 = dma.done.wait (%p869_p8), %s204_s30, 3072  }
  0x2c   : > { %768 = vsyncadd (%p869_p8), %s204_s30, 4294964224  ;;  %p244_p0 = scmp.lt.s32.totalorder %s787_s15, 1  ;;  %v800_v0 = vmov 0   ;;  %v348_v2 = vlaneseq  ;;  %v268_v10 = vld [vmem:[%s910_s5] sm:$0xff]  ;;  %v269_v11 = vld [vmem:[%s910_s5 + $0x8] sm:$0xff]  ;;  %s609_s18 = sshll.u32 %s906_s28, 3 }
  0x2d   : > { %686 = vset.pattern.permute.xlu0 %v800_v0  ;;  %v270_v16 = vld [vmem:[%s910_s5 + $0x10] sm:$0xff]  ;;  %v271_v17 = vld [vmem:[%s910_s5 + $0x18] sm:$0xff]  ;;  %v272_v18 = vld [vmem:[%s910_s5 + $0x20] sm:$0xff]  ;;  %s241_s19 = scalar_lea.vmem [#allocation6], %s609_s18  ;;  %s613_s22 = sshll.u32 %s787_s15, 7 }
  0x2e   : > { %s245_s4 = scalar_select %p244_p0, %s787_s15, 1  ;;  %v349_v3 = vshrl.u32 %v348_v2, 7  ;;  %v273_v20 = vld [vmem:[%s910_s5 + $0x28] sm:$0xff]  ;;  %v274_v21 = vld [vmem:[%s910_s5 + $0x30] sm:$0xff]  ;;  %v936_v22 = vld [vmem:[%s910_s5 + $0x38] sm:$0xff] }
  0x2f   : > { %v276_v24 = vld [vmem:[%s910_s5 + $0x40] sm:$0xff]  ;;  %v277_v25 = vld [vmem:[%s910_s5 + $0x48] sm:$0xff]  ;;  %v278_v26 = vld [vmem:[%s910_s5 + $0x50] sm:$0xff]  ;;  %s495_s21 = sshll.u32 %s241_s19, 4  ;;  %s801_s7 = smov [#allocation6]   ;;  %s1019_s21 = int_to_ptr.vmem [resolvable:$true] %s495_s21 }
  0x30   : > { %s610_s6 = sshll.u32 %s245_s4, 3  ;;  %v350_v4 = vsub.s32 0, %v349_v3  ;;  %v354_v5 = vsub.s32 1, %v349_v3  ;;  %v358_v7 = vsub.s32 2, %v349_v3  ;;  %v362_v8 = vsub.s32 3, %v349_v3  ;;  %v279_v30 = vld [vmem:[%s910_s5 + $0x58] sm:$0xff] }
  0x31   : > { %s255_s9 = scalar_lea.vmem %s1066_s2, %s610_s6  ;;  %s250_s11 = scalar_lea.vmem %s1065_s1, %s610_s6  ;;  %v366_v9 = vsub.s32 4, %v349_v3  ;;  %v370_v12 = vsub.s32 5, %v349_v3  ;;  %v374_v13 = vsub.s32 6, %v349_v3  ;;  %v378_v14 = vsub.s32 7, %v349_v3  ;;  %v280_v31 = vld [vmem:[%s910_s5 + $0x60] sm:$0xff]  ;;  %v281_v32 = vld [vmem:[%s910_s5 + $0x68] sm:$0xff] }
  0x32   : > { %v293_v1 = vld [vmem:[%s255_s9] sm:$0xff]  ;;  %v282_v37 = vld [vmem:[%s910_s5 + $0x70] sm:$0xff]  ;;  %v283_v38 = vld [vmem:[%s910_s5 + $0x78] sm:$0xff]  ;;  %s482_s4 = scalar_lea.sflag [#allocation5], %s906_s28  ;;  %s715_s6 = scalar_lea.vmem %s1019_s21, 128 }
  0x33   : > { %296 = vperm.xlu0 %686, %v293_v1   ;;  %v292_v6 = vld [vmem:[%s250_s11] sm:$0xff]  ;;  %v285_v44 = vld [vmem:[%s910_s5 + $0x88] sm:$0xff]  ;;  %v286_v45 = vld [vmem:[%s910_s5 + $0x90] sm:$0xff]  ;;  %p716_p8 = scmp.ne.s32.totalorder %s1019_s21, %s715_s6  ;;  %s719_s15 = sshll.u32 %s801_s7, 4  ;;  %s720_s15 = int_to_ptr.vmem [resolvable:$false] %s719_s15 }
  0x34   : > { %v931_v19 = vrot.slane %v292_v6, %v350_v4  ;;  %v938_v23 = vrot.slane %v292_v6, %v354_v5  ;;  %v943_v27 = vrot.slane %v292_v6, %v358_v7  ;;  %v945_v28 = vrot.slane %v292_v6, %v362_v8  ;;  %v284_v39 = vld [vmem:[%s910_s5 + $0x80] sm:$0xff]  ;;  %v287_v50 = vld [vmem:[%s910_s5 + $0x98] sm:$0xff]  ;;  %v289_v56 = vld [vmem:[%s910_s5 + $0xa8] sm:$0xff]  ;;  %s721_s8 = scalar_lea.vmem %s720_s15, 256  ;;  %p722_p3 = scmp.lt.s32.totalorder %s1019_s21, %s720_s15 }
  0x35   : > { %v947_v29 = vrot.slane %v292_v6, %v366_v9  ;;  %v953_v34 = vrot.slane %v292_v6, %v370_v12  ;;  %v955_v35 = vrot.slane %v292_v6, %v374_v13  ;;  %v957_v36 = vrot.slane %v292_v6, %v378_v14  ;;  %v288_v51 = vld [vmem:[%s910_s5 + $0xa0] sm:$0xff]  ;;  %v290_v61 = vld [vmem:[%s910_s5 + $0xb0] sm:$0xff]  ;;  %p717_p12 = pnand %p716_p8, %p873_p9  ;;  %p723_p5 = scmp.lt.s32.totalorder %s721_s8, %s715_s6 }
  0x37   : > { %p718_p1 = pneg %p717_p12  ;;  %p724_p6 = por %p723_p5, %p722_p3 }
  0x39   : > { %p725_p4 = pnand %p724_p6, %p718_p1 }
  0xae   : > { %v926_v15 = vpop.permute.xlu0 %296 }
  0xaf   : > { %v299_v33 = vsub.f32 %v268_v10, %v926_v15  ;;  %v300_v40 = vsub.f32 %v269_v11, %v926_v15  ;;  %v301_v41 = vsub.f32 %v270_v16, %v926_v15  ;;  %v302_v42 = vsub.f32 %v271_v17, %v926_v15 }
  0xb0   : > { %v303_v43 = vsub.f32 %v272_v18, %v926_v15  ;;  %v304_v46 = vsub.f32 %v273_v20, %v926_v15  ;;  %v305_v47 = vsub.f32 %v274_v21, %v926_v15  ;;  %v307_v48 = vsub.f32 %v276_v24, %v926_v15 }
  0xb1   : > { %v308_v49 = vsub.f32 %v277_v25, %v926_v15  ;;  %v306_v52 = vsub.f32 %v936_v22, %v926_v15  ;;  %v309_v53 = vsub.f32 %v278_v26, %v926_v15  ;;  %v310_v54 = vsub.f32 %v279_v30, %v926_v15 }
  0xb2   : > { %v311_v55 = vsub.f32 %v280_v31, %v926_v15  ;;  %v312_v57 = vsub.f32 %v281_v32, %v926_v15  ;;  %v313_v58 = vsub.f32 %v282_v37, %v926_v15  ;;  %v314_v59 = vsub.f32 %v283_v38, %v926_v15 }
  0xb3   : > { %v315_v60 = vsub.f32 %v284_v39, %v926_v15  ;;  %v316_v62 = vsub.f32 %v285_v44, %v926_v15  ;;  %v317_v63 = vsub.f32 %v286_v45, %v926_v15  ;;  %v323_v0 = vand.u32 2147483647, %v299_v33 }
  0xb4   : > { %v324_v1 = vand.u32 2147483647, %v300_v40  ;;  %v318_v2 = vsub.f32 %v287_v50, %v926_v15  ;;  %v319_v3 = vsub.f32 %v288_v51, %v926_v15  ;;  %v331_v4 = vand.u32 2147483647, %v307_v48 }
  0xb5   : > { %v332_v5 = vand.u32 2147483647, %v308_v49  ;;  %v320_v6 = vsub.f32 %v289_v56, %v926_v15  ;;  %v325_v7 = vand.u32 2147483647, %v301_v41  ;;  %v326_v8 = vand.u32 2147483647, %v302_v42 }
  0xb6   : > { %v333_v9 = vand.u32 2147483647, %v309_v53  ;;  %v321_v10 = vsub.f32 %v290_v61, %v926_v15  ;;  %v327_v11 = vand.u32 2147483647, %v303_v43  ;;  %v328_v12 = vand.u32 2147483647, %v304_v46 }
  0xb7   : > { %v334_v13 = vand.u32 2147483647, %v310_v54  ;;  %v329_v14 = vand.u32 2147483647, %v305_v47  ;;  %v335_v16 = vand.u32 2147483647, %v311_v55  ;;  %v388_v17 = vmul.f32 %v931_v19, %v323_v0 }
  0xb8   : > { %v389_v18 = vmul.f32 %v938_v23, %v324_v1  ;;  %v339_v20 = vand.u32 2147483647, %v315_v60  ;;  %v340_v21 = vand.u32 2147483647, %v316_v62  ;;  %v396_v22 = vmul.f32 %v931_v19, %v331_v4  ;;  %v291_v43 = vld [vmem:[%s910_s5 + $0xb8] sm:$0xff]  ;;  %s493_s5 = scalar_lea.hbm %s1067_s3, %s613_s22 }
  0xb9   : > { %v397_v24 = vmul.f32 %v938_v23, %v332_v5  ;;  %v330_v25 = vand.u32 2147483647, %v306_v52  ;;  %v336_v26 = vand.u32 2147483647, %v312_v57  ;;  %v390_v30 = vmul.f32 %v943_v27, %v325_v7 }
  0xba   : > { %v398_v31 = vmul.f32 %v943_v27, %v333_v9  ;;  %v337_v32 = vand.u32 2147483647, %v313_v58  ;;  %v341_v33 = vand.u32 2147483647, %v317_v63  ;;  %v391_v37 = vmul.f32 %v945_v28, %v326_v8 }
  0xbb   : > { %v399_v38 = vmul.f32 %v945_v28, %v334_v13  ;;  %v338_v39 = vand.u32 2147483647, %v314_v59  ;;  %v342_v40 = vand.u32 2147483647, %v318_v2  ;;  %v392_v41 = vmul.f32 %v947_v29, %v327_v11 }
  0xbc   : > { %v400_v42 = vmul.f32 %v947_v29, %v335_v16  ;;  %v404_v44 = vmul.f32 %v931_v19, %v339_v20  ;;  %v405_v45 = vmul.f32 %v938_v23, %v340_v21  ;;  %v420_v46 = vadd.f32 %v396_v22, %v388_v17 }
  0xbd   : > { %v422_v47 = vadd.f32 %v397_v24, %v389_v18  ;;  %v343_v48 = vand.u32 2147483647, %v319_v3  ;;  %v393_v49 = vmul.f32 %v953_v34, %v328_v12  ;;  %v401_v50 = vmul.f32 %v953_v34, %v336_v26 }
  0xbe   : > { %v424_v51 = vadd.f32 %v398_v31, %v390_v30  ;;  %v406_v52 = vmul.f32 %v943_v27, %v341_v33  ;;  %v421_v53 = vadd.f32 %v420_v46, %v404_v44  ;;  %v426_v55 = vadd.f32 %v399_v38, %v391_v37 }
  0xbf   : > { %v423_v54 = vadd.f32 %v422_v47, %v405_v45  ;;  %v322_v56 = vsub.f32 %v291_v43, %v926_v15  ;;  %v344_v57 = vand.u32 2147483647, %v320_v6  ;;  %v394_v19 = vmul.f32 %v955_v35, %v329_v14 }
  0xc0   : > { %v402_v23 = vmul.f32 %v955_v35, %v337_v32  ;;  %v407_v58 = vmul.f32 %v945_v28, %v342_v40  ;;  %v425_v59 = vadd.f32 %v424_v51, %v406_v52  ;;  %v428_v60 = vadd.f32 %v400_v42, %v392_v41 }
  0xc1   : > { %v463_v61 = vadd.f32 %v423_v54, %v421_v53  ;;  %v345_v62 = vand.u32 2147483647, %v321_v10  ;;  %v395_v63 = vmul.f32 %v957_v36, %v330_v25  ;;  %v403_v27 = vmul.f32 %v957_v36, %v338_v39 }
  0xc2   : > { %v408_v0 = vmul.f32 %v947_v29, %v343_v48  ;;  %v427_v1 = vadd.f32 %v426_v55, %v407_v58  ;;  %v430_v2 = vadd.f32 %v401_v50, %v393_v49  ;;  %v346_v3 = vand.u32 2147483647, %v322_v56 }
  0xc3   : > { %v464_v15 = vadd.f32 %v463_v61, %v425_v59  ;;  %v409_v4 = vmul.f32 %v953_v34, %v344_v57  ;;  %v432_v6 = vadd.f32 %v402_v23, %v394_v19  ;;  %v410_v28 = vmul.f32 %v955_v35, %v345_v62 }
  0xc4   : > { %v429_v5 = vadd.f32 %v428_v60, %v408_v0  ;;  %v434_v9 = vadd.f32 %v403_v27, %v395_v63  ;;  %v411_v11 = vmul.f32 %v957_v36, %v346_v3 }
  0xc5   : > { %v465_v7 = vadd.f32 %v464_v15, %v427_v1  ;;  %v431_v8 = vadd.f32 %v430_v2, %v409_v4  ;;  %v433_v12 = vadd.f32 %v432_v6, %v410_v28 }
  0xc6   : > { %v435_v29 = vadd.f32 %v434_v9, %v411_v11 }
  0xc7   : > { %v466_v10 = vadd.f32 %v465_v7, %v429_v5 }
  0xc9   : > { %v467_v13 = vadd.f32 %v466_v10, %v431_v8 }
  0xcb   : > { %v468_v14 = vadd.f32 %v467_v13, %v433_v12 }
  0xcd   : > { %v469_v16 = vadd.f32 %v468_v14, %v435_v29 }
  0xcf   : > { %470 = vadd.xlane.f32.xlu0 %v469_v16 }
 0x158   : > { %v471_v17 = vpop.xlane.xlu0 %470 }
 0x159   : > { %v472_v34 = vrot.slane %v471_v17, 4 }
 0x15b   : > { %v473_v18 = vadd.f32 %v472_v34, %v471_v17 }
 0x15d   : > { %v474_v20 = vrot.slane %v473_v18, 2 }
 0x15f   : > { %v475_v21 = vadd.f32 %v474_v20, %v473_v18 }
 0x161   : > { %v476_v35 = vrot.slane %v475_v21, 1 }
 0x163   : > { %v477_v22 = vadd.f32 %v476_v35, %v475_v21 }
 0x165   : > { %619 = vpush %v477_v22 }
 0x196   : > { %s620_s23 = spop %619 }
 0x197   : > { %v479_v36 = vstv %s620_s23 }
 0x198   : > { %480 = vst [vmem:[%s241_s19] sm:$0xff] %v479_v36 }
 0x199   : > { %728 = shalt.err (!%p725_p4)
}
 0x19a   : > { %s729_s9 = scalar_lea.hbm %s493_s5, 128  ;;  %s733_s10 = scalar_lea.hbm %s1067_s3, 256 }
 0x19b   : > { %p730_p7 = scmp.ne.s32.totalorder %s493_s5, %s729_s9  ;;  %p734_p2 = scmp.lt.s32.totalorder %s493_s5, %s1067_s3 }
 0x19c   : > { %p735_p0 = scmp.lt.s32.totalorder %s733_s10, %s729_s9 }
 0x19d   : > { %p731_p10 = pnand %p730_p7, %p873_p9 }
 0x19e   : > { %p736_p8 = por %p735_p0, %p734_p2 }
 0x19f   : > { %p732_p13 = pneg %p731_p10 }
 0x1a1   : > { %p737_p12 = pnand %p736_p8, %p732_p13 }
 0x1a3   : > { %740 = shalt.err (!%p737_p12)
}
 0x1a4   : > { %623 = dma.vmem_to_hbm [thread:$0]  (%p873_p9), %s1019_s21, 128, %s493_s5, %s482_s4  }
 0x1a5 PF: > { %s507_s19 = sand.u32 1, %s775_s12   ;;  %p1073_p1 = scmp.ge.s32.totalorder %s795_s17, 2 }
 0x1a6   : > { %s508_s22 = scalar_lea.sflag [#allocation5], %s507_s19 }
 0x1a7   : > { %p630_p3 = pnand %p1073_p1, %p880_p11 }
 0x1a9   : > { %p631_p5 = pneg %p630_p3 }
 0x1ab   : > { %770 = dma.done.wait (%p631_p5), %s508_s22, 128  }
 0x1ac   : > { %772 = vsyncadd (%p631_p5), %s508_s22, 4294967168  ;;  %s19_s17 = sadd.s32 1, %s795_s17   ;;  %s1074_s12 = smov %s779_s13 }
 0x1ad   : > { %p16_p6 = scmp.ge.s32.totalorder %s19_s17, 4   ;;  %s1075_s13 = smov %s783_s14 }
 0x1ae   : > { %s1076_s14 = smov %s878_s26  ;;  %s1077_s15 = smov %s791_s16 }
 0x1af   : > { %s1078_s16 = smov %s1080_s20  ;;  %18 = sbr.rel (!%p16_p6) target bundleno = 6 (0x6), region = 91 }
 0x1b4   :  { %513 = vsyncpa [#allocation4], 1 }
 0x1b5   :  { %515 = vsyncpa [#allocation4 + $0x1], 1 }
 0x1b6   :  { %516 = vsyncpa [#allocation5], 1 }
 0x1b7   :  { %518 = vsyncpa [#allocation5 + $0x1], 1 }

</bundles_post_ra>
